<compile_context>
chip_gen: v6e
topology: v6e:2x2x1
jax: 0.10.0
libtpu: 0.0.40
codegen_flags: <defaults>
</compile_context>

<pallas_src>
import functools

import jax
import jax.numpy as jnp
from jax.experimental import pallas as pl
from jax.experimental.pallas import tpu as pltpu

_LANE = 128
_CHUNK_ROWS = 512                # in-kernel compute chunk: (512,128) f32 = 256 KiB
_STREAM_BUF_BUDGET = 32 << 20    # budget for double-buffered pipeline buffers (all streams)
_VMEM_HEADROOM = 12 << 20        # chunk intermediates / semaphores / scratch
_MAX_BLOCK_ROWS = 32768          # hard cap on rows per block
_MIN_GRID = 8                    # keep >= 8 grid steps so v7x's two TCs both get work


def _round_up(x, m):
    return ((x + m - 1) // m) * m


def _choose_block_rows(rows, bytes_per_row):
    """Largest block (in 128-lane rows) whose double-buffered streams fit the
    VMEM budget, while keeping >= _MIN_GRID grid steps when possible."""
    max_by_vmem = max(8, _STREAM_BUF_BUDGET // (2 * bytes_per_row))
    target = max(-(-rows // _MIN_GRID), 8)
    br = min(max_by_vmem, _MAX_BLOCK_ROWS, target)
    if br >= _CHUNK_ROWS:
        br = (br // _CHUNK_ROWS) * _CHUNK_ROWS   # keep block a multiple of the chunk
    else:
        br = _round_up(br, 8)                    # (8,128) tiling constraint
    return br


# ---------------------------------------------------------------------------
# Kernel helpers
# ---------------------------------------------------------------------------
def _partial_sum(v, chunk):
    """(chunk, 128) -> (8, 128) partial sum via pure VPU vreg adds."""
    return v.reshape(chunk // 8, 8, _LANE).sum(axis=0)


# ---------------------------------------------------------------------------
# 'none' kernels (chunked elementwise, loss_weight folded in)
# ---------------------------------------------------------------------------
def _charb_none_kernel(p_ref, t_ref, o_ref, *, eps, loss_weight, block_rows, chunk):
    nchunks = block_rows // chunk

    @pl.loop(0, nchunks)
    def _(c):
        r0 = pl.multiple_of(c * chunk, chunk)
        sl = pl.ds(r0, chunk)
        d = p_ref[sl, :].astype(jnp.float32) - t_ref[sl, :].astype(jnp.float32)
        v = jnp.sqrt(d * d + jnp.float32(eps)) * jnp.float32(loss_weight)
        o_ref[sl, :] = v.astype(o_ref.dtype)


def _charb_none_w_kernel(p_ref, t_ref, w_ref, o_ref, *, eps, loss_weight, block_rows, chunk):
    nchunks = block_rows // chunk

    @pl.loop(0, nchunks)
    def _(c):
        r0 = pl.multiple_of(c * chunk, chunk)
        sl = pl.ds(r0, chunk)
        d = p_ref[sl, :].astype(jnp.float32) - t_ref[sl, :].astype(jnp.float32)
        v = jnp.sqrt(d * d + jnp.float32(eps)) * w_ref[sl, :].astype(jnp.float32)
        o_ref[sl, :] = (v * jnp.float32(loss_weight)).astype(o_ref.dtype)


# ---------------------------------------------------------------------------
# 'mean'/'sum' kernels: per-block (8,128) partial sums, chunked accumulation
# ---------------------------------------------------------------------------
def _charb_sum_kernel(p_ref, t_ref, o_ref, *, eps, rows, block_rows, chunk, needs_mask):
    i = pl.program_id(0)
    nchunks = block_rows // chunk

    def block_partial(mask_rows):
        def body(c, acc):
            r0 = pl.multiple_of(c * chunk, chunk)
            sl = pl.ds(r0, chunk)
            d = p_ref[sl, :].astype(jnp.float32) - t_ref[sl, :].astype(jnp.float32)
            v = jnp.sqrt(d * d + jnp.float32(eps))
            if mask_rows:
                # Row-level compare (never multiplies by 128 -> no i32 overflow).
                gr = (jax.lax.broadcasted_iota(jnp.int32, (chunk, _LANE), 0)
                      + i * block_rows + r0)
                v = jnp.where(gr < rows, v, 0.0)
            return acc + _partial_sum(v, chunk)
        return jax.lax.fori_loop(0, nchunks, body, jnp.zeros((8, _LANE), jnp.float32))

    if needs_mask:
        is_last = i == pl.num_programs(0) - 1

        @pl.when(is_last)
        def _():
            o_ref[0] = block_partial(True)

        @pl.when(jnp.logical_not(is_last))
        def _():
            o_ref[0] = block_partial(False)
    else:
        o_ref[0] = block_partial(False)


def _charb_sum_w_kernel(p_ref, t_ref, w_ref, o_ref, *, eps, rows, block_rows, chunk, needs_mask):
    i = pl.program_id(0)
    nchunks = block_rows // chunk

    def block_partial(mask_rows):
        def body(c, acc):
            r0 = pl.multiple_of(c * chunk, chunk)
            sl = pl.ds(r0, chunk)
            d = p_ref[sl, :].astype(jnp.float32) - t_ref[sl, :].astype(jnp.float32)
            v = jnp.sqrt(d * d + jnp.float32(eps)) * w_ref[sl, :].astype(jnp.float32)
            if mask_rows:
                gr = (jax.lax.broadcasted_iota(jnp.int32, (chunk, _LANE), 0)
                      + i * block_rows + r0)
                v = jnp.where(gr < rows, v, 0.0)
            return acc + _partial_sum(v, chunk)
        return jax.lax.fori_loop(0, nchunks, body, jnp.zeros((8, _LANE), jnp.float32))

    if needs_mask:
        is_last = i == pl.num_programs(0) - 1

        @pl.when(is_last)
        def _():
            o_ref[0] = block_partial(True)

        @pl.when(jnp.logical_not(is_last))
        def _():
            o_ref[0] = block_partial(False)
    else:
        o_ref[0] = block_partial(False)


# ---------------------------------------------------------------------------
# Wrapper
# ---------------------------------------------------------------------------
@functools.partial(jax.jit, static_argnames=("reduction", "loss_weight", "eps"))
def _charbonnier_impl(pred, target, weight, reduction, loss_weight, eps):
    orig_shape = pred.shape
    orig_dtype = pred.dtype
    total = pred.size
    weighted = weight is not None

    if total == 0:
        if reduction == "none":
            return jnp.zeros(orig_shape, orig_dtype)
        s = jnp.float32(0.0)
        if reduction == "mean":
            s = s / jnp.float32(total)  # nan, matches torch mean of empty
        return (jnp.float32(loss_weight) * s).astype(orig_dtype)

    rows = total // _LANE          # 128-aligned prefix rows
    main = rows * _LANE
    tail = total - main            # < 128 leftover elements

    p_flat = pred.reshape(-1)
    t_flat = target.reshape(-1)
    w_flat = weight.reshape(-1) if weighted else None

    # ---- tail (< 128 elements): plain jnp, no pad, no extra HBM pass over main ----
    tail_vals = None
    if tail:
        dt = p_flat[main:].astype(jnp.float32) - t_flat[main:].astype(jnp.float32)
        tail_vals = jnp.sqrt(dt * dt + jnp.float32(eps))
        if weighted:
            tail_vals = tail_vals * w_flat[main:].astype(jnp.float32)

    # ---- main (rows, 128) slab through the Pallas kernel ----
    if rows > 0:
        def as2d(x):
            x = x if tail == 0 else x[:main]     # pure reshape when already aligned
            return x.reshape(rows, _LANE)

        ins = [as2d(p_flat), as2d(t_flat)]
        if weighted:
            ins.append(as2d(w_flat))

        in_itemsize = sum(x.dtype.itemsize for x in ins)
        out_itemsize = jnp.dtype(orig_dtype).itemsize if reduction == "none" else 0
        bytes_per_row = _LANE * (in_itemsize + out_itemsize)

        block_rows = _choose_block_rows(rows, bytes_per_row)
        chunk = min(_CHUNK_ROWS, block_rows)
        grid = (pl.cdiv(rows, block_rows),)
        needs_mask = (rows % block_rows) != 0

        params = pltpu.CompilerParams(
            dimension_semantics=("parallel",),
            vmem_limit_bytes=int(2 * bytes_per_row * block_rows + _VMEM_HEADROOM),
        )
        in_tile = pl.BlockSpec((block_rows, _LANE), lambda i: (i, 0))

        in_bytes = main * in_itemsize
        flops_per_elem = 3 + (1 if weighted else 0) + (1 if reduction != "none" else 0)

    if reduction == "none":
        pieces = []
        if rows > 0:
            kernel = functools.partial(
                _charb_none_kernel if not weighted else _charb_none_w_kernel,
                eps=eps, loss_weight=loss_weight, block_rows=block_rows, chunk=chunk)
            cost = pl.CostEstimate(
                flops=flops_per_elem * main,
                transcendentals=main,
                bytes_accessed=in_bytes + main * out_itemsize)
            out2 = pl.pallas_call(
                kernel,
                out_shape=jax.ShapeDtypeStruct((rows, _LANE), orig_dtype),
                grid_spec=pltpu.PrefetchScalarGridSpec(
                    num_scalar_prefetch=0,
                    grid=grid,
                    in_specs=[in_tile] * len(ins),
                    out_specs=pl.BlockSpec((block_rows, _LANE), lambda i: (i, 0)),
                ),
                compiler_params=params,
                cost_estimate=cost,
            )(*ins)
            pieces.append(out2.reshape(-1))
        if tail:
            pieces.append((tail_vals * jnp.float32(loss_weight)).astype(orig_dtype))
        flat = pieces[0] if len(pieces) == 1 else jnp.concatenate(pieces)
        return flat.reshape(orig_shape)

    # 'mean' / 'sum': per-block (8,128) partial sums, tiny final reduction in JAX.
    s = jnp.float32(0.0)
    if rows > 0:
        kernel = functools.partial(
            _charb_sum_kernel if not weighted else _charb_sum_w_kernel,
            eps=eps, rows=rows, block_rows=block_rows, chunk=chunk,
            needs_mask=needs_mask)
        cost = pl.CostEstimate(
            flops=flops_per_elem * main,
            transcendentals=main,
            bytes_accessed=in_bytes + grid[0] * 8 * _LANE * 4)
        partials = pl.pallas_call(
            kernel,
            out_shape=jax.ShapeDtypeStruct((grid[0], 8, _LANE), jnp.float32),
            grid_spec=pltpu.PrefetchScalarGridSpec(
                num_scalar_prefetch=0,
                grid=grid,
                in_specs=[in_tile] * len(ins),
                out_specs=pl.BlockSpec((1, 8, _LANE), lambda i: (i, 0, 0)),
            ),
            compiler_params=params,
            cost_estimate=cost,
        )(*ins)
        # TODO(synk): partials accumulate in f32; for >~1e9-element tensors expect
        # tiny drift vs an f64 reference (PyTorch also sums in f32 here).
        s = s + jnp.sum(partials)
    if tail:
        s = s + jnp.sum(tail_vals)

    if reduction == "mean":
        # basicsr weight_reduce_loss convention: mean over element count.
        s = s / jnp.float32(total)
    return (jnp.float32(loss_weight) * s).astype(orig_dtype)


class CharbonnierLossPallas:
    """Pallas TPU port of CharbonnierLoss (robust/differentiable L1)."""

    def __init__(self, loss_weight=1.0, reduction="mean", eps=1e-12):
        if reduction not in ("none", "mean", "sum"):
            raise ValueError(
                f"Unsupported reduction mode: {reduction}. "
                f"Supported ones are: ['none', 'mean', 'sum']")
        self.loss_weight = float(loss_weight)
        self.reduction = reduction
        self.eps = float(eps)

    def __call__(self, pred, target, weight=None, **kwargs):
        # TODO(synk): avg_factor kwarg (from basicsr's weighted_loss decorator) not supported.
        return _charbonnier_impl(
            pred, target, weight,
            reduction=self.reduction,
            loss_weight=self.loss_weight,
            eps=self.eps,
        )


# ---------------------------------------------------------------------------
# Main
# ---------------------------------------------------------------------------
if __name__ == "__main__":
    key = jax.random.PRNGKey(0)
    k1, k2, k3, k4, k5, k6, k7, k8, k9 = jax.random.split(key, 9)

    N, C, H, W = 2, 4, 16, 16
    pred = jax.random.normal(k1, (N, C, H, W), dtype=jnp.float32)
    target = jax.random.normal(k2, (N, C, H, W), dtype=jnp.float32)
    weight = jax.random.uniform(k3, (N, C, H, W), dtype=jnp.float32)

    eps = 1e-12
    loss_mean = CharbonnierLossPallas(1.0, "mean", eps)(pred, target)
    loss_sum = CharbonnierLossPallas(0.5, "sum", eps)(pred, target, weight)
    loss_none = CharbonnierLossPallas(2.0, "none", eps)(pred, target)
    loss_none_w = CharbonnierLossPallas(1.5, "none", eps)(pred, target, weight)

    # total < 128 -> pure-jnp tail path (no kernel, no pad).
    p_odd = jax.random.normal(k4, (3, 5, 7), dtype=jnp.float32)
    t_odd = jax.random.normal(k5, (3, 5, 7), dtype=jnp.float32)
    loss_odd = CharbonnierLossPallas(1.0, "mean", eps)(p_odd, t_odd)

    # rows % block_rows != 0 -> masked partial last block in the sum kernel.
    p_m = jax.random.normal(k6, (2, 4, 16, 17), dtype=jnp.float32)
    t_m = jax.random.normal(k7, (2, 4, 16, 17), dtype=jnp.float32)
    loss_masked = CharbonnierLossPallas(1.0, "mean", eps)(p_m, t_m)

    # non-128-multiple with both a kernel prefix and a jnp tail ('none' concat path).
    p_c = jax.random.normal(k8, (2, 4, 17, 5), dtype=jnp.float32)
    t_c = jax.random.normal(k9, (2, 4, 17, 5), dtype=jnp.float32)
    loss_concat = CharbonnierLossPallas(1.0, "none", eps)(p_c, t_c)

    jax.block_until_ready((loss_mean, loss_sum, loss_none, loss_none_w,
                           loss_odd, loss_masked, loss_concat))

    # Reference checks in plain JAX
    ref = jnp.sqrt((pred - target) ** 2 + eps)
    assert jnp.allclose(loss_mean, jnp.mean(ref), rtol=1e-4, atol=1e-5)
    assert jnp.allclose(loss_sum, 0.5 * jnp.sum(ref * weight), rtol=1e-4, atol=1e-4)
    assert jnp.allclose(loss_none, 2.0 * ref, rtol=1e-5, atol=1e-6)
    assert loss_none.shape == (N, C, H, W)
    assert jnp.allclose(loss_none_w, 1.5 * ref * weight, rtol=1e-5, atol=1e-6)

    ref_odd = jnp.mean(jnp.sqrt((p_odd - t_odd) ** 2 + eps))
    assert jnp.allclose(loss_odd, ref_odd, rtol=1e-4, atol=1e-5)

    ref_m = jnp.mean(jnp.sqrt((p_m - t_m) ** 2 + eps))
    assert jnp.allclose(loss_masked, ref_m, rtol=1e-4, atol=1e-5)

    ref_c = jnp.sqrt((p_c - t_c) ** 2 + eps)
    assert loss_concat.shape == p_c.shape
    assert jnp.allclose(loss_concat, ref_c, rtol=1e-5, atol=1e-6)

    print("KERNEL_OK")
</pallas_src>

<mosaic_0001>
module attributes {stable_mosaic.version = 11 : i64} {
  func.func @_charb_sum_kernel(%arg0: i32, %arg1: memref<8x128xf32, #tpu.memory_space<vmem>>, %arg2: memref<8x128xf32, #tpu.memory_space<vmem>>, %arg3: memref<1x8x128xf32, #tpu.memory_space<vmem>>) attributes {dimension_semantics = [#tpu.dimension_semantics<parallel>], iteration_bounds = array<i64: 2>, scalar_prefetch = 0 : i64, scratch_operands = 0 : i64, tpu.core_type = #tpu.core_type<tc>, window_params = [{transform_indices = @transform_0, window_bounds = array<i64: 8, 128>}, {transform_indices = @transform_1, window_bounds = array<i64: 8, 128>}, {transform_indices = @transform_2, window_bounds = array<i64: 1, 8, 128>}]} {
    %cst = arith.constant 0.000000e+00 : f32
    %0 = vector.broadcast %cst : f32 to vector<8x128xf32>
    %c0_i32 = arith.constant 0 : i32
    %c8_i32 = arith.constant 8 : i32
    %1 = arith.muli %c0_i32, %c8_i32 : i32
    %2 = tpu.assume_multiple %1, 8 : i32
    %3 = arith.index_cast %2 : i32 to index
    %c0 = arith.constant 0 : index
    %4 = vector.load %arg1[%3, %c0] : memref<8x128xf32, #tpu.memory_space<vmem>>, vector<8x128xf32>
    %5 = arith.index_cast %2 : i32 to index
    %c0_0 = arith.constant 0 : index
    %6 = vector.load %arg2[%5, %c0_0] : memref<8x128xf32, #tpu.memory_space<vmem>>, vector<8x128xf32>
    %7 = arith.subf %4, %6 : vector<8x128xf32>
    %8 = arith.mulf %7, %7 : vector<8x128xf32>
    %cst_1 = arith.constant 9.99999996E-13 : f32
    %9 = vector.broadcast %cst_1 : f32 to vector<8x128xf32>
    %10 = arith.addf %8, %9 : vector<8x128xf32>
    %11 = math.sqrt %10 : vector<8x128xf32>
    %12 = vector.shape_cast %11 : vector<8x128xf32> to vector<1x8x128xf32>
    %cst_2 = arith.constant dense<0.000000e+00> : vector<8x128xf32>
    %13 = vector.multi_reduction <add>, %12, %cst_2 [0] : vector<1x8x128xf32> to vector<8x128xf32>
    %14 = arith.addf %0, %13 : vector<8x128xf32>
    %c1_i32 = arith.constant 1 : i32
    %c0_3 = arith.constant 0 : index
    %c0_4 = arith.constant 0 : index
    %c0_5 = arith.constant 0 : index
    %15 = vector.load %arg3[%c0_3, %c0_4, %c0_5] : memref<1x8x128xf32, #tpu.memory_space<vmem>>, vector<1x8x128xf32>
    %16 = vector.shape_cast %15 : vector<1x8x128xf32> to vector<8x128xf32>
    %17 = vector.shape_cast %14 : vector<8x128xf32> to vector<1x8x128xf32>
    tpu.vector_store %arg3[%c0_3, %c0_4, %c0_5], %17 {strides = array<i32>} : memref<1x8x128xf32, #tpu.memory_space<vmem>>, vector<1x8x128xf32>,
    return
  }
  func.func @transform_0(%arg0: i32) -> (i32, i32) {
    %c0_i32 = arith.constant 0 : i32
    %c0_i32_0 = arith.constant 0 : i32
    return %arg0, %c0_i32 : i32, i32
  }
  func.func @transform_1(%arg0: i32) -> (i32, i32) {
    %c0_i32 = arith.constant 0 : i32
    %c0_i32_0 = arith.constant 0 : i32
    return %arg0, %c0_i32 : i32, i32
  }
  func.func @transform_2(%arg0: i32) -> (i32, i32, i32) {
    %c0_i32 = arith.constant 0 : i32
    %c0_i32_0 = arith.constant 0 : i32
    %c0_i32_1 = arith.constant 0 : i32
    return %arg0, %c0_i32, %c0_i32_0 : i32, i32, i32
  }
}

</mosaic_0001>

<bundles_post_ra>
// kernel: _charbonnier_impl.1
= control target key start
LH: loop header
LB: loop body
LE: loop exit
PB: predicated region body
PF: predicated region fallthrough
CT: control target
= control target key end

     0   :  { %s279_s9 = smov 0   ;;  %s299_s0 = inlined_call_operand.vmem [shape: f32[16,128], index: 0, kind: input, shape index: {}]   ;;  %s300_s1 = inlined_call_operand.vmem [shape: f32[16,128], index: 1, kind: input, shape index: {}]   ;;  %s301_s2 = inlined_call_operand.vmem [shape: f32[2,8,128], index: 2, kind: output, shape index: {}]  }
   0x1 LB: > { %s236_s10 = sadd.s32 4294967295, %s262_s9   ;;  %p240_p0 = scmp.ge.s32.totalorder %s262_s9, 1  ;;  %s262_s9 = sphi %s279_s9, %s12_s9  }
   0x2   : > { %p120_p1 = scmp.lt.s32.totalorder %s262_s9, 3 }
   0x4   : > { %p121_p2 = pnand %p240_p0, %p120_p1 }
   0x5   : > { %p144_p3 = scmp.lt.s32.totalorder (!%p121_p2), %s236_s10, 1 }
   0x6   : > { %124 = sbr.rel (%p121_p2) target bundleno = 41 (0x29), region = 28 }
   0xb   : > { %s303_s10 = smov (!%p144_p3, %s236_s10), 1 }
   0xc   : > { %s241_s11 = sshll.u32 %s303_s10, 3 }
   0xd   : > { %s147_s14 = scalar_lea.vmem %s299_s0, %s241_s11  ;;  %s151_s17 = scalar_lea.vmem %s300_s1, %s241_s11 }
   0xe   : > { %v156_v0 = vld [vmem:[%s147_s14] sm:$0xff]  ;;  %s155_s20 = scalar_lea.vmem %s301_s2, %s241_s11 }
   0xf   : > { %v157_v1 = vld [vmem:[%s151_s17] sm:$0xff] }
  0x10   : > { %v158_v2 = vsub.f32 %v156_v0, %v157_v1 }
  0x12   : > { %v159_v3 = vmul.f32 %v158_v2, %v158_v2 }
  0x14   : > { %v160_v4 = vadd.f32 1e-12, %v159_v3 }
  0x16   : > { %254 = vrsqrt.f32 %v160_v4  ;;  %vm163_vm0 = vcmp.eq.f32.partialorder %v160_v4, inf  ;;  %v166_v6 = vand.u32 2147483648, %v160_v4  ;;  %vm165_vm1 = vcmp.eq.f32.partialorder %v160_v4, 0.0 }
  0x23   : > { %v255_v5 = vpop.eup %254 }
  0x24   : > { %v162_v7 = vmul.f32 %v255_v5, %v160_v4 }
  0x26   : > { %v164_v8 = vsel %vm163_vm0, %v160_v4, %v162_v7 }
  0x27   : > { %v167_v9 = vsel %vm165_vm1, %v166_v6, %v164_v8 }
  0x28   : > { %170 = vst [vmem:[%s155_s20] sm:$0xff] %v167_v9 }
  0x29 PF: > { %s12_s9 = sadd.s32 1, %s262_s9  }
  0x2a   : > { %p9_p4 = scmp.ge.s32.totalorder %s12_s9, 4  }
  0x2c   :  { %11 = sbr.rel (!%p9_p4) target bundleno = 1 (0x1), region = 61 }

</bundles_post_ra>
